<compile_context>
chip_gen: v7x
topology: tpu7x:2x2x1
jax: 0.10.0
libtpu: 0.0.40
codegen_flags: <defaults>
</compile_context>

<pallas_src>
import functools

import jax
import jax.numpy as jnp
from jax.experimental import pallas as pl
from jax.experimental.pallas import tpu as pltpu


def _round_up(x, m):
    return ((x + m - 1) // m) * m


def _vmem_capacity_bytes():
    """Physical VMEM per TensorCore; conservative 64 MiB (v7x) if unknown."""
    try:
        return int(pltpu.get_tpu_info().vmem_capacity_bytes)
    except Exception:
        return 64 * 1024 * 1024


# ----------------------------------------------------------------------------
# Kernels
# ----------------------------------------------------------------------------
def _ffn_kernel_resident(x_ref, w1_ref, b1_ref, w2_ref, b2_ref, o_ref):
    """Both weights fully VMEM-resident (constant index maps); 1-D grid over M."""
    h = jnp.dot(x_ref[...], w1_ref[...], preferred_element_type=jnp.float32)
    h = jnp.maximum(h + b1_ref[...].astype(jnp.float32), 0.0)  # ReLU in f32
    # Dropout: eval-mode identity.
    # TODO(synk): training-mode dropout (pltpu.prng_* masking) not implemented.
    out = jnp.dot(h.astype(w2_ref.dtype), w2_ref[...],
                  preferred_element_type=jnp.float32)
    o_ref[...] = (out + b2_ref[...].astype(jnp.float32)).astype(o_ref.dtype)


def _ffn_tiled_body(x_ref, w1_ref, b1_ref, w2_ref, b2_ref, o_ref, acc_ref):
    """H-tiled path: accumulate second matmul over the (arbitrary) h grid axis.

    acc_ref may be o_ref itself (f32 output -> accumulate in place, no scratch).
    """
    h_idx = pl.program_id(1)

    @pl.when(h_idx == 0)
    def _init():
        # Seed the accumulator with the second-layer bias (added exactly once).
        acc_ref[...] = jnp.broadcast_to(
            b2_ref[...].astype(acc_ref.dtype), acc_ref.shape)

    h = jnp.dot(x_ref[...], w1_ref[...], preferred_element_type=jnp.float32)
    h = jnp.maximum(h + b1_ref[...].astype(jnp.float32), 0.0)  # ReLU in f32
    # Dropout: eval-mode identity.
    # TODO(synk): training-mode dropout (pltpu.prng_* masking) not implemented.

    acc_ref[...] += jnp.dot(h.astype(w2_ref.dtype), w2_ref[...],
                            preferred_element_type=jnp.float32
                            ).astype(acc_ref.dtype)

    if acc_ref is not o_ref:  # trace-time Python check
        @pl.when(h_idx == pl.num_programs(1) - 1)
        def _finalize():
            o_ref[...] = acc_ref[...].astype(o_ref.dtype)


def _ffn_kernel_tiled_acc(x_ref, w1_ref, b1_ref, w2_ref, b2_ref, o_ref, acc_ref):
    _ffn_tiled_body(x_ref, w1_ref, b1_ref, w2_ref, b2_ref, o_ref, acc_ref)


def _ffn_kernel_tiled_inplace(x_ref, w1_ref, b1_ref, w2_ref, b2_ref, o_ref):
    # Output dtype is f32: accumulate directly into the resident output block.
    _ffn_tiled_body(x_ref, w1_ref, b1_ref, w2_ref, b2_ref, o_ref, o_ref)


# ----------------------------------------------------------------------------
# Wrapper
# ----------------------------------------------------------------------------
@functools.partial(jax.jit,
                   static_argnames=("tile_m", "block_h", "force_path"))
def feed_forward(x, w1, b1, w2, b2, *, tile_m=1024, block_h=512,
                 force_path=None):
    """relu(x @ w1 + b1) @ w2 + b2  (dropout in eval mode).

    x: [..., E]; w1: [E, H]; b1: [H]; w2: [H, E]; b2: [E]
    (weights stored transposed vs torch.nn.Linear, i.e. [in, out]).

    The matmuls run in the weights' dtype (cast them once with prepare_params
    outside the per-call path for bf16 MXU throughput); accumulation, biases
    and ReLU are f32.  `force_path` in {None, "resident", "tiled"} is for tests.
    """
    orig_shape = x.shape
    out_dtype = x.dtype
    E = orig_shape[-1]
    H = w1.shape[1]

    op_dtype = w1.dtype
    op_bytes = jnp.dtype(op_dtype).itemsize
    out_bytes = jnp.dtype(out_dtype).itemsize

    x2d = x.reshape(-1, E).astype(op_dtype)
    N = x2d.shape[0]
    n128 = _round_up(max(N, 1), 128)

    # Pad the hidden dim to a lane multiple if needed (zeros are exact: the
    # padded hidden units contribute relu(0)=0 to the second matmul).
    Hp = _round_up(H, 128)
    if Hp != H:
        w1 = jnp.pad(w1, ((0, 0), (0, Hp - H)))
        w2 = jnp.pad(w2, ((0, Hp - H), (0, 0)))
        b1 = jnp.pad(b1, ((0, Hp - H),))
    b1_2d = b1.reshape(1, Hp).astype(jnp.float32)
    b2_2d = b2.reshape(1, E).astype(jnp.float32)

    # --- trace-time tile selection against the chip's real VMEM -------------
    vmem_cap = _vmem_capacity_bytes()
    budget = int(vmem_cap * 0.8)  # headroom for compiler-internal scratch

    bias_bytes = 2 * (Hp + E) * 4               # double-buffered f32 biases

    def io_bytes(tm):                           # x + out tiles, double-buffered
        return 2 * tm * E * op_bytes + 2 * tm * E * out_bytes

    weight_resident_bytes = 2 * 2 * E * Hp * op_bytes  # both weights, 2 bufs

    tm_cap = max(128, min(tile_m, n128))
    if n128 >= 256:
        # Keep >=2 token tiles so v7x's two TensorCores both get work.
        tm_cap = max(128, min(tm_cap, _round_up((n128 + 1) // 2, 128)))
    tm_candidates = [t for t in (1024, 512, 256, 128) if t <= tm_cap]
    if not tm_candidates or tm_candidates[0] != tm_cap:
        tm_candidates.insert(0, tm_cap)

    use_acc = out_dtype != jnp.float32          # f32 out -> accumulate in place

    selected = None  # (kind, tm, th, footprint)
    if force_path in (None, "resident"):
        for tm in tm_candidates:
            fp = weight_resident_bytes + bias_bytes + io_bytes(tm)
            if fp <= budget:
                selected = ("resident", tm, Hp, fp)
                break
        if selected is None and force_path == "resident":
            tm = tm_candidates[-1]
            selected = ("resident", tm, Hp,
                        weight_resident_bytes + bias_bytes + io_bytes(tm))

    if selected is None:
        th_cap = max(128, min(block_h, Hp))
        th_candidates = [d for d in range(128, th_cap + 1, 128) if Hp % d == 0]
        if not th_candidates:
            th_candidates = [Hp]                # awkward H: single full-H slab
        # Prefer 256-multiples (v6e/v7x 256x256 MXU), then larger tiles.
        th_candidates.sort(key=lambda d: (d % 256 != 0, -d))

        def tiled_fp(tm, th):
            return (2 * 2 * E * th * op_bytes + bias_bytes + io_bytes(tm)
                    + (tm * E * 4 if use_acc else 0))

        for tm in tm_candidates:                # bigger tm = fewer weight passes
            for th in th_candidates:
                fp = tiled_fp(tm, th)
                if fp <= budget:
                    selected = ("tiled", tm, th, fp)
                    break
            if selected is not None:
                break
        if selected is None:
            tm, th = tm_candidates[-1], min(th_candidates)
            selected = ("tiled", tm, th, tiled_fp(tm, th))

    kind, tm, th, fp = selected

    # Pad tokens to a tile multiple instead of asserting divisibility.
    n_pad = _round_up(max(N, 1), tm)
    if n_pad != N:
        x2d = jnp.pad(x2d, ((0, n_pad - N), (0, 0)))
    num_m = n_pad // tm

    if kind == "resident":
        grid = (num_m,)
        in_specs = [
            pl.BlockSpec((tm, E), lambda i: (i, 0)),    # x tile
            pl.BlockSpec((E, Hp), lambda i: (0, 0)),    # w1, resident
            pl.BlockSpec((1, Hp), lambda i: (0, 0)),    # b1, resident
            pl.BlockSpec((Hp, E), lambda i: (0, 0)),    # w2, resident
            pl.BlockSpec((1, E), lambda i: (0, 0)),     # b2, resident
        ]
        out_specs = pl.BlockSpec((tm, E), lambda i: (i, 0))
        scratch_shapes = []
        kernel = _ffn_kernel_resident
        dim_sem = ("parallel",)
        weight_passes = 1
    else:
        grid = (num_m, Hp // th)
        in_specs = [
            pl.BlockSpec((tm, E), lambda i, h: (i, 0)),  # x tile (fixed over h)
            pl.BlockSpec((E, th), lambda i, h: (0, h)),  # w1 H-slab
            pl.BlockSpec((1, th), lambda i, h: (0, h)),  # b1 H-slab
            pl.BlockSpec((th, E), lambda i, h: (h, 0)),  # w2 H-slab
            pl.BlockSpec((1, E), lambda i, h: (0, 0)),   # b2 (constant)
        ]
        out_specs = pl.BlockSpec((tm, E), lambda i, h: (i, 0))
        if use_acc:
            scratch_shapes = [pltpu.VMEM((tm, E), jnp.float32)]
            kernel = _ffn_kernel_tiled_acc
        else:
            scratch_shapes = []
            kernel = _ffn_kernel_tiled_inplace
        dim_sem = ("parallel", "arbitrary")
        weight_passes = num_m

    vmem_limit = max(32 << 20,
                     min(int(vmem_cap * 0.92), fp + fp // 4 + (8 << 20)))

    cost = pl.CostEstimate(
        flops=4 * n_pad * E * Hp,                              # two matmuls
        transcendentals=0,
        bytes_accessed=(n_pad * E * op_bytes                   # x
                        + 2 * E * Hp * op_bytes * weight_passes  # w1 + w2
                        + (Hp + E) * 4 * weight_passes           # biases
                        + n_pad * E * out_bytes),                # output
    )

    out = pl.pallas_call(
        kernel,
        out_shape=jax.ShapeDtypeStruct((n_pad, E), out_dtype),
        grid_spec=pltpu.PrefetchScalarGridSpec(
            num_scalar_prefetch=0,
            grid=grid,
            in_specs=in_specs,
            out_specs=out_specs,
            scratch_shapes=scratch_shapes,
        ),
        compiler_params=pltpu.CompilerParams(
            dimension_semantics=dim_sem,
            vmem_limit_bytes=int(vmem_limit),
        ),
        cost_estimate=cost,
    )(x2d, w1, b1_2d, w2, b2_2d)

    if n_pad != N:
        out = out[:N]
    return out.reshape(orig_shape)


def prepare_params(w1, b1, w2, b2, compute_dtype=jnp.bfloat16):
    """One-time cast of the weight matrices to the MXU compute dtype.

    Do this when loading parameters, NOT inside the per-layer call path, so the
    big E*H convert does not add an extra HBM pass on every forward.
    """
    return (w1.astype(compute_dtype), b1.astype(jnp.float32),
            w2.astype(compute_dtype), b2.astype(jnp.float32))


def _init_params(key, embed_dim, hidden_dim, dtype=jnp.float32):
    """Deterministic init mimicking nn.Linear's uniform(-1/sqrt(fan_in), +)."""
    k1, k2, k3, k4 = jax.random.split(key, 4)
    lim1 = 1.0 / jnp.sqrt(embed_dim)
    lim2 = 1.0 / jnp.sqrt(hidden_dim)
    # stored transposed: [in, out]
    w1 = jax.random.uniform(k1, (embed_dim, hidden_dim), dtype, -lim1, lim1)
    b1 = jax.random.uniform(k2, (hidden_dim,), dtype, -lim1, lim1)
    w2 = jax.random.uniform(k3, (hidden_dim, embed_dim), dtype, -lim2, lim2)
    b2 = jax.random.uniform(k4, (embed_dim,), dtype, -lim2, lim2)
    return w1, b1, w2, b2


if __name__ == "__main__":
    key = jax.random.PRNGKey(0)
    # Small but lane-dense demo shapes (E, H multiples of 128).
    batch, seq, embed_dim, hidden_dim = 2, 8, 128, 256

    kx, kp = jax.random.split(key)
    x = jax.random.normal(kx, (batch, seq, embed_dim), dtype=jnp.float32)
    w1, b1, w2, b2 = _init_params(kp, embed_dim, hidden_dim)

    # Plain-JAX f32 reference (eval-mode dropout == identity).
    ref = jnp.maximum(x.reshape(-1, embed_dim) @ w1 + b1, 0.0) @ w2 + b2
    ref = ref.reshape(batch, seq, embed_dim)

    # 1) f32 weights, weights-resident fast path (exact check).
    out_f32 = jax.block_until_ready(feed_forward(x, w1, b1, w2, b2))
    assert out_f32.shape == ref.shape
    assert jnp.allclose(out_f32, ref, atol=1e-4, rtol=1e-4)

    # 2) f32 weights, forced H-tiled path (exercises in-place f32 accumulation).
    out_f32_t = jax.block_until_ready(
        feed_forward(x, w1, b1, w2, b2, block_h=128, force_path="tiled"))
    assert jnp.allclose(out_f32_t, ref, atol=1e-4, rtol=1e-4)

    # 3) bf16 weights (cast once, outside the per-call path), resident path.
    w1b, b1b, w2b, b2b = prepare_params(w1, b1, w2, b2, jnp.bfloat16)
    out_bf16 = jax.block_until_ready(feed_forward(x, w1b, b1b, w2b, b2b))
    assert out_bf16.shape == ref.shape
    assert jnp.allclose(out_bf16, ref, atol=6e-2, rtol=6e-2)

    # 4) bf16 weights + bf16 activations, forced H-tiled path (exercises the
    #    f32 scratch accumulator variant).
    out_bf16_t = jax.block_until_ready(
        feed_forward(x.astype(jnp.bfloat16), w1b, b1b, w2b, b2b,
                     block_h=128, force_path="tiled"))
    assert jnp.allclose(out_bf16_t.astype(jnp.float32), ref,
                        atol=8e-2, rtol=8e-2)

    print("KERNEL_OK")
</pallas_src>

<mosaic_0001>
module attributes {stable_mosaic.version = 11 : i64} {
  func.func @_ffn_kernel_resident(%arg0: i32, %arg1: memref<128x128xf32, #tpu.memory_space<vmem>>, %arg2: memref<128x256xf32, #tpu.memory_space<vmem>>, %arg3: memref<1x256xf32, #tpu.memory_space<vmem>>, %arg4: memref<256x128xf32, #tpu.memory_space<vmem>>, %arg5: memref<1x128xf32, #tpu.memory_space<vmem>>, %arg6: memref<128x128xf32, #tpu.memory_space<vmem>>) attributes {dimension_semantics = [#tpu.dimension_semantics<parallel>], iteration_bounds = array<i64: 1>, scalar_prefetch = 0 : i64, scratch_operands = 0 : i64, tpu.core_type = #tpu.core_type<tc>, window_params = [{transform_indices = @transform_0, window_bounds = array<i64: 128, 128>}, {pipeline_mode = #tpu.pipeline_mode<synchronous>, transform_indices = @transform_1, window_bounds = array<i64: 128, 256>}, {pipeline_mode = #tpu.pipeline_mode<synchronous>, transform_indices = @transform_2, window_bounds = array<i64: 1, 256>}, {pipeline_mode = #tpu.pipeline_mode<synchronous>, transform_indices = @transform_3, window_bounds = array<i64: 256, 128>}, {pipeline_mode = #tpu.pipeline_mode<synchronous>, transform_indices = @transform_4, window_bounds = array<i64: 1, 128>}, {transform_indices = @transform_5, window_bounds = array<i64: 128, 128>}]} {
    %c0 = arith.constant 0 : index
    %c0_0 = arith.constant 0 : index
    %0 = vector.load %arg1[%c0, %c0_0] : memref<128x128xf32, #tpu.memory_space<vmem>>, vector<128x128xf32>
    %c0_1 = arith.constant 0 : index
    %c0_2 = arith.constant 0 : index
    %1 = vector.load %arg2[%c0_1, %c0_2] : memref<128x256xf32, #tpu.memory_space<vmem>>, vector<128x256xf32>
    %cst = arith.constant dense<0.000000e+00> : vector<128x256xf32>
    %2 = tpu.matmul %0, %1, %cst {dimension_numbers = #tpu.dot_dimension_numbers<[1], [0], [0], [1], [0, 0, 1, 1], [], []>} : vector<128x128xf32>, vector<128x256xf32>, vector<128x256xf32> -> vector<128x256xf32>
    %c0_3 = arith.constant 0 : index
    %c0_4 = arith.constant 0 : index
    %3 = vector.load %arg3[%c0_3, %c0_4] : memref<1x256xf32, #tpu.memory_space<vmem>>, vector<1x256xf32>
    %4 = vector.broadcast %3 : vector<1x256xf32> to vector<128x256xf32>
    %5 = arith.addf %2, %4 : vector<128x256xf32>
    %cst_5 = arith.constant 0.000000e+00 : f32
    %6 = vector.broadcast %cst_5 : f32 to vector<128x256xf32>
    %7 = arith.maximumf %5, %6 : vector<128x256xf32>
    %c0_6 = arith.constant 0 : index
    %c0_7 = arith.constant 0 : index
    %8 = vector.load %arg4[%c0_6, %c0_7] : memref<256x128xf32, #tpu.memory_space<vmem>>, vector<256x128xf32>
    %cst_8 = arith.constant dense<0.000000e+00> : vector<128x128xf32>
    %9 = tpu.matmul %7, %8, %cst_8 {dimension_numbers = #tpu.dot_dimension_numbers<[1], [0], [0], [1], [0, 0, 1, 1], [], []>} : vector<128x256xf32>, vector<256x128xf32>, vector<128x128xf32> -> vector<128x128xf32>
    %c0_9 = arith.constant 0 : index
    %c0_10 = arith.constant 0 : index
    %10 = vector.load %arg5[%c0_9, %c0_10] : memref<1x128xf32, #tpu.memory_space<vmem>>, vector<1x128xf32>
    %11 = vector.broadcast %10 : vector<1x128xf32> to vector<128x128xf32>
    %12 = arith.addf %9, %11 : vector<128x128xf32>
    %c0_11 = arith.constant 0 : index
    %c0_12 = arith.constant 0 : index
    %13 = vector.load %arg6[%c0_11, %c0_12] : memref<128x128xf32, #tpu.memory_space<vmem>>, vector<128x128xf32>
    tpu.vector_store %arg6[%c0_11, %c0_12], %12 {strides = array<i32>} : memref<128x128xf32, #tpu.memory_space<vmem>>, vector<128x128xf32>,
    return
  }
  func.func @transform_0(%arg0: i32) -> (i32, i32) {
    %c0_i32 = arith.constant 0 : i32
    %c0_i32_0 = arith.constant 0 : i32
    return %arg0, %c0_i32 : i32, i32
  }
  func.func @transform_1(%arg0: i32) -> (i32, i32) {
    %c0_i32 = arith.constant 0 : i32
    %c0_i32_0 = arith.constant 0 : i32
    %c0_i32_1 = arith.constant 0 : i32
    return %c0_i32, %c0_i32_0 : i32, i32
  }
  func.func @transform_2(%arg0: i32) -> (i32, i32) {
    %c0_i32 = arith.constant 0 : i32
    %c0_i32_0 = arith.constant 0 : i32
    %c0_i32_1 = arith.constant 0 : i32
    return %c0_i32, %c0_i32_0 : i32, i32
  }
  func.func @transform_3(%arg0: i32) -> (i32, i32) {
    %c0_i32 = arith.constant 0 : i32
    %c0_i32_0 = arith.constant 0 : i32
    %c0_i32_1 = arith.constant 0 : i32
    return %c0_i32, %c0_i32_0 : i32, i32
  }
  func.func @transform_4(%arg0: i32) -> (i32, i32) {
    %c0_i32 = arith.constant 0 : i32
    %c0_i32_0 = arith.constant 0 : i32
    %c0_i32_1 = arith.constant 0 : i32
    return %c0_i32, %c0_i32_0 : i32, i32
  }
  func.func @transform_5(%arg0: i32) -> (i32, i32) {
    %c0_i32 = arith.constant 0 : i32
    %c0_i32_0 = arith.constant 0 : i32
    return %arg0, %c0_i32 : i32, i32
  }
}

</mosaic_0001>

<bundles_post_ra>
// kernel: feed_forward.1
= control target key start
LH: loop header
LB: loop body
LE: loop exit
PB: predicated region body
PF: predicated region fallthrough
CT: control target
= control target key end

     0   :  { %10 = vsyncpa [#allocation3], 0  ;;  %s940_s0 = inlined_call_operand.vmem [shape: f32[128,128], index: 0, kind: input, shape index: {}]   ;;  %s941_s1 = inlined_call_operand.hbm [shape: f32[128,256], index: 1, kind: input, shape index: {}]   ;;  %s942_s2 = inlined_call_operand.vmem [shape: f32[1,256], index: 2, kind: input, shape index: {}]   ;;  %s943_s3 = inlined_call_operand.hbm [shape: f32[256,128], index: 3, kind: input, shape index: {}]   ;;  %s944_s4 = inlined_call_operand.vmem [shape: f32[1,128], index: 4, kind: input, shape index: {}]   ;;  %s945_s5 = inlined_call_operand.vmem [shape: f32[128,128], index: 5, kind: output, shape index: {}]  }
   0x1   :  { %11 = vsyncpa [#allocation5], 0  ;;  %s707_s18 = smov [#allocation2]   ;;  %s659_s22 = scalar_lea.hbm %s941_s1, 4096 }
   0x2   :  { %s19_s19 = sshll.u32 %s707_s18, 4  ;;  %p660_p0 = scmp.ne.s32.totalorder %s941_s1, %s659_s22  ;;  %s20_s19 = int_to_ptr.vmem [resolvable:$true] %s19_s19 }
   0x3   :  { %p663_p1 = scmp.lt.u32.totalorder %s659_s22, %s941_s1 }
   0x5   :  { %p665_p2 = pnand %p663_p1, %p660_p0 }
   0x7   :  { %668 = shalt.err (!%p665_p2)
}
   0x8   :  { %s669_s27 = scalar_lea.vmem %s20_s19, 4096  ;;  %p674_p4 = scmp.lt.s32.totalorder %s20_s19, %s20_s19 }
   0x9   :  { %p670_p3 = scmp.ne.s32.totalorder %s20_s19, %s669_s27  ;;  %p675_p5 = scmp.lt.s32.totalorder %s669_s27, %s669_s27 }
   0xb   :  { %p676_p6 = por %p675_p5, %p674_p4 }
   0xd   :  { %p677_p7 = pnand %p676_p6, %p670_p3 }
   0xf   :  { %680 = shalt.err (!%p677_p7)
}
  0x10   :  { %s708_s28 = smov 256   ;;  %s709_s29 = smov 16  }
  0x11   :  { %25 = dma.hbm_to_vmem [thread:$0]  %s941_s1, 4096, %s20_s19, [#allocation3], %s708_s28, %s708_s28, %s709_s29  }
  0x12   :  { %s710_s7 = smov [#allocation4]   ;;  %s681_s11 = scalar_lea.hbm %s943_s3, 4096 }
  0x13   :  { %s33_s8 = sshll.u32 %s710_s7, 4  ;;  %p682_p8 = scmp.ne.s32.totalorder %s943_s3, %s681_s11  ;;  %s34_s8 = int_to_ptr.vmem [resolvable:$true] %s33_s8 }
  0x14   :  { %p685_p9 = scmp.lt.u32.totalorder %s681_s11, %s943_s3 }
  0x16   :  { %p687_p10 = pnand %p685_p9, %p682_p8 }
  0x18   :  { %690 = shalt.err (!%p687_p10)
}
  0x19   :  { %s691_s16 = scalar_lea.vmem %s34_s8, 4096  ;;  %p696_p12 = scmp.lt.s32.totalorder %s34_s8, %s34_s8 }
  0x1a   :  { %p692_p11 = scmp.ne.s32.totalorder %s34_s8, %s691_s16  ;;  %p697_p13 = scmp.lt.s32.totalorder %s691_s16, %s691_s16 }
  0x1c   :  { %p698_p0 = por %p697_p13, %p696_p12 }
  0x1e   :  { %p699_p1 = pnand %p698_p0, %p692_p11 }
  0x20   :  { %702 = shalt.err (!%p699_p1)
}
  0x21   :  { %s711_s1 = smov 128   ;;  %s712_s17 = smov 8  }
  0x22   :  { %39 = dma.hbm_to_vmem [thread:$0]  %s943_s3, 4096, %s34_s8, [#allocation5], %s711_s1, %s711_s1, %s712_s17  }
  0x23   :  { %703 = dma.done.wait [#allocation3], 4096  }
  0x24   :  { %704 = vsyncadd [#allocation3], 4294963200 }
  0x25   :  { %705 = dma.done.wait [#allocation5], 4096  }
  0x26   :  { %706 = vsyncadd [#allocation5], 4294963200  ;;  %v713_v0 = vmov 0.0   ;;  %v65_v1 = vld [vmem:[#allocation2 + $0x8] sm:$0xff]  ;;  %v67_v2 = vld [vmem:[#allocation2 + $0x18] sm:$0xff] }
  0x27   :  { %172 = vmatprep.mubr.f32.mxu0 %v713_v0  ;;  %v64_v3 = vld [vmem:[#allocation2] sm:$0xff]  ;;  %v588_v4 = vpack.c.bf16 %v67_v2, %v65_v1  ;;  %v66_v5 = vld [vmem:[#allocation2 + $0x10] sm:$0xff]  ;;  %v69_v6 = vld [vmem:[#allocation2 + $0x28] sm:$0xff] }
  0x28   :  { %v71_v7 = vld [vmem:[#allocation2 + $0x38] sm:$0xff]  ;;  %v590_v8 = vpack.c.bf16 %v66_v5, %v64_v3  ;;  %v68_v10 = vld [vmem:[#allocation2 + $0x20] sm:$0xff]  ;;  %v70_v11 = vld [vmem:[#allocation2 + $0x30] sm:$0xff] }
  0x29   :  { %v592_v9 = vpack.c.bf16 %v71_v7, %v69_v6  ;;  %v73_v12 = vld [vmem:[#allocation2 + $0x48] sm:$0xff]  ;;  %589 = vmatprep.subr.bf16.mxu0 %v588_v4  ;;  %v75_v13 = vld [vmem:[#allocation2 + $0x58] sm:$0xff]  ;;  %v594_v14 = vpack.c.bf16 %v70_v11, %v68_v10  ;;  %v72_v16 = vld [vmem:[#allocation2 + $0x40] sm:$0xff] }
  0x2a   :  { %591 = vmatpush1.bf16.msra.mxu0 %v590_v8  ;;  %v596_v15 = vpack.c.bf16 %v75_v13, %v73_v12  ;;  %v74_v17 = vld [vmem:[#allocation2 + $0x50] sm:$0xff]  ;;  %v77_v18 = vld [vmem:[#allocation2 + $0x68] sm:$0xff]  ;;  %v79_v19 = vld [vmem:[#allocation2 + $0x78] sm:$0xff] }
  0x2b   :  { %593 = vmatprep.subr.bf16.mxu0 %v592_v9  ;;  %v598_v20 = vpack.c.bf16 %v74_v17, %v72_v16  ;;  %v600_v21 = vpack.c.bf16 %v79_v19, %v77_v18  ;;  %v76_v22 = vld [vmem:[#allocation2 + $0x60] sm:$0xff]  ;;  %v78_v23 = vld [vmem:[#allocation2 + $0x70] sm:$0xff]  ;;  %v81_v24 = vld [vmem:[#allocation2 + $0x88] sm:$0xff] }
  0x2c   :  { %v83_v25 = vld [vmem:[#allocation2 + $0x98] sm:$0xff]  ;;  %v602_v26 = vpack.c.bf16 %v78_v23, %v76_v22  ;;  %v80_v28 = vld [vmem:[#allocation2 + $0x80] sm:$0xff]  ;;  %v82_v29 = vld [vmem:[#allocation2 + $0x90] sm:$0xff] }
  0x2d   :  { %v604_v27 = vpack.c.bf16 %v83_v25, %v81_v24  ;;  %v85_v30 = vld [vmem:[#allocation2 + $0xa8] sm:$0xff]  ;;  %v87_v31 = vld [vmem:[#allocation2 + $0xb8] sm:$0xff]  ;;  %v84_v32 = vld [vmem:[#allocation2 + $0xa0] sm:$0xff]  ;;  %v606_v34 = vpack.c.bf16 %v82_v29, %v80_v28 }
  0x2e   :  { %595 = vmatpush1.bf16.msra.mxu0 %v594_v14  ;;  %v86_v33 = vld [vmem:[#allocation2 + $0xb0] sm:$0xff]  ;;  %v89_v35 = vld [vmem:[#allocation2 + $0xc8] sm:$0xff]  ;;  %v91_v36 = vld [vmem:[#allocation2 + $0xd8] sm:$0xff]  ;;  %v608_v40 = vpack.c.bf16 %v87_v31, %v85_v30 }
  0x2f   :  { %597 = vmatprep.subr.bf16.mxu0 %v596_v15  ;;  %v317_v37 = vld [vmem:[#allocation4 + $0x80] sm:$0xff]  ;;  %v318_v38 = vld [vmem:[#allocation4 + $0x88] sm:$0xff]  ;;  %v319_v43 = vld [vmem:[#allocation4 + $0x90] sm:$0xff]  ;;  %v610_v51 = vpack.c.bf16 %v86_v33, %v84_v32  ;;  %v612_v55 = vpack.c.bf16 %v91_v36, %v89_v35 }
  0x30   :  { %v301_v39 = vld [vmem:[#allocation4] sm:$0xff]  ;;  %v620_v41 = vpack.c.bf16 %v318_v38, %v317_v37  ;;  %v302_v42 = vld [vmem:[#allocation4 + $0x8] sm:$0xff]  ;;  %v320_v44 = vld [vmem:[#allocation4 + $0x98] sm:$0xff] }
  0x31   :  { %v622_v45 = vpack.c.bf16 %v302_v42, %v301_v39  ;;  %v624_v46 = vpack.c.bf16 %v320_v44, %v319_v43  ;;  %v303_v47 = vld [vmem:[#allocation4 + $0x10] sm:$0xff]  ;;  %v304_v48 = vld [vmem:[#allocation4 + $0x18] sm:$0xff]  ;;  %v321_v49 = vld [vmem:[#allocation4 + $0xa0] sm:$0xff] }
  0x32   :  { %599 = vmatpush1.bf16.msra.mxu0 %v598_v20  ;;  %621 = vmatprep.subr.bf16.mxu1 %v620_v41  ;;  %v322_v50 = vld [vmem:[#allocation4 + $0xa8] sm:$0xff]  ;;  %v88_v52 = vld [vmem:[#allocation2 + $0xc0] sm:$0xff]  ;;  %v90_v53 = vld [vmem:[#allocation2 + $0xd0] sm:$0xff]  ;;  %v626_v54 = vpack.c.bf16 %v304_v48, %v303_v47 }
  0x33   :  { %601 = vmatprep.subr.bf16.mxu0 %v600_v21  ;;  %623 = vmatpush3.bf16.msra.mxu1 %v622_v45  ;;  %v93_v56 = vld [vmem:[#allocation2 + $0xe8] sm:$0xff]  ;;  %v628_v57 = vpack.c.bf16 %v322_v50, %v321_v49  ;;  %v305_v58 = vld [vmem:[#allocation4 + $0x20] sm:$0xff]  ;;  %v95_v60 = vld [vmem:[#allocation2 + $0xf8] sm:$0xff]  ;;  %v614_v63 = vpack.c.bf16 %v90_v53, %v88_v52  ;;  %v98_v50 = vlaneseq }
  0x34   :  { %625 = vmatprep.subr.bf16.mxu1 %v624_v46  ;;  %v306_v59 = vld [vmem:[#allocation4 + $0x28] sm:$0xff]  ;;  %v323_v61 = vld [vmem:[#allocation4 + $0xb0] sm:$0xff]  ;;  %v324_v62 = vld [vmem:[#allocation4 + $0xb8] sm:$0xff]  ;;  %v616_v3 = vpack.c.bf16 %v95_v60, %v93_v56 }
  0x35   :  { %v92_v1 = vld [vmem:[#allocation2 + $0xe0] sm:$0xff]  ;;  %v630_v2 = vpack.c.bf16 %v306_v59, %v305_v58  ;;  %v94_v4 = vld [vmem:[#allocation2 + $0xf0] sm:$0xff]  ;;  %v632_v5 = vpack.c.bf16 %v324_v62, %v323_v61  ;;  %v308_v7 = vld [vmem:[#allocation4 + $0x38] sm:$0xff] }
  0x36   :  { %603 = vmatpush1.bf16.msra.mxu0 %v602_v26  ;;  %v307_v6 = vld [vmem:[#allocation4 + $0x30] sm:$0xff]  ;;  %v325_v8 = vld [vmem:[#allocation4 + $0xc0] sm:$0xff]  ;;  %v326_v9 = vld [vmem:[#allocation4 + $0xc8] sm:$0xff]  ;;  %v618_v10 = vpack.c.bf16 %v94_v4, %v92_v1 }
  0x37   :  { %605 = vmatprep.subr.bf16.mxu0 %v604_v27  ;;  %627 = vmatpush3.bf16.msra.mxu1 %v626_v54  ;;  %v634_v11 = vpack.c.bf16 %v308_v7, %v307_v6  ;;  %v636_v12 = vpack.c.bf16 %v326_v9, %v325_v8  ;;  %v309_v13 = vld [vmem:[#allocation4 + $0x40] sm:$0xff]  ;;  %v310_v14 = vld [vmem:[#allocation4 + $0x48] sm:$0xff]  ;;  %v327_v15 = vld [vmem:[#allocation4 + $0xd0] sm:$0xff] }
  0x38   :  { %629 = vmatprep.subr.bf16.mxu1 %v628_v57  ;;  %v328_v16 = vld [vmem:[#allocation4 + $0xd8] sm:$0xff]  ;;  %v48_v17 = vld [vmem:[%s940_s0] sm:$0xff]  ;;  %v638_v18 = vpack.c.bf16 %v310_v14, %v309_v13  ;;  %v311_v20 = vld [vmem:[#allocation4 + $0x50] sm:$0xff] }
  0x39   :  { %v640_v19 = vpack.c.bf16 %v328_v16, %v327_v15  ;;  %v312_v21 = vld [vmem:[#allocation4 + $0x58] sm:$0xff]  ;;  %v329_v22 = vld [vmem:[#allocation4 + $0xe0] sm:$0xff]  ;;  %v330_v23 = vld [vmem:[#allocation4 + $0xe8] sm:$0xff] }
  0x3a   :  { %607 = vmatpush1.bf16.msra.mxu0 %v606_v34  ;;  %v49_v24 = vld [vmem:[%s940_s0 + $0x8] sm:$0xff]  ;;  %v642_v25 = vpack.c.bf16 %v312_v21, %v311_v20  ;;  %v644_v26 = vpack.c.bf16 %v330_v23, %v329_v22  ;;  %v50_v27 = vld [vmem:[%s940_s0 + $0x10] sm:$0xff]  ;;  %v51_v28 = vld [vmem:[%s940_s0 + $0x18] sm:$0xff] }
  0x3b   :  { %609 = vmatprep.subr.bf16.mxu0 %v608_v40  ;;  %631 = vmatpush3.bf16.msra.mxu1 %v630_v2  ;;  %v52_v29 = vld [vmem:[%s940_s0 + $0x20] sm:$0xff]  ;;  %v53_v30 = vld [vmem:[%s940_s0 + $0x28] sm:$0xff]  ;;  %v54_v31 = vld [vmem:[%s940_s0 + $0x30] sm:$0xff] }
  0x3c   :  { %633 = vmatprep.subr.bf16.mxu1 %v632_v5  ;;  %v55_v32 = vld [vmem:[%s940_s0 + $0x38] sm:$0xff]  ;;  %v56_v33 = vld [vmem:[%s940_s0 + $0x40] sm:$0xff]  ;;  %v57_v34 = vld [vmem:[%s940_s0 + $0x48] sm:$0xff] }
  0x3d   :  { %v58_v35 = vld [vmem:[%s940_s0 + $0x50] sm:$0xff]  ;;  %v59_v36 = vld [vmem:[%s940_s0 + $0x58] sm:$0xff]  ;;  %v60_v37 = vld [vmem:[%s940_s0 + $0x60] sm:$0xff] }
  0x3e   :  { %611 = vmatpush1.bf16.msra.mxu0 %v610_v51  ;;  %v61_v38 = vld [vmem:[%s940_s0 + $0x68] sm:$0xff]  ;;  %v62_v39 = vld [vmem:[%s940_s0 + $0x70] sm:$0xff]  ;;  %v63_v40 = vld [vmem:[%s940_s0 + $0x78] sm:$0xff]  ;;  %v99_v51 = vshrl.u32 %v98_v50, 7 }
  0x3f   :  { %613 = vmatprep.subr.bf16.mxu0 %v612_v55  ;;  %635 = vmatpush3.bf16.msra.mxu1 %v634_v11  ;;  %v313_v41 = vld [vmem:[#allocation4 + $0x60] sm:$0xff]  ;;  %v314_v42 = vld [vmem:[#allocation4 + $0x68] sm:$0xff]  ;;  %v331_v44 = vld [vmem:[#allocation4 + $0xf0] sm:$0xff] }
  0x40   :  { %637 = vmatprep.subr.bf16.mxu1 %v636_v12  ;;  %v646_v43 = vpack.c.bf16 %v314_v42, %v313_v41  ;;  %v332_v45 = vld [vmem:[#allocation4 + $0xf8] sm:$0xff]  ;;  %v315_v47 = vld [vmem:[#allocation4 + $0x70] sm:$0xff]  ;;  %v96_v52 = vld [vmem:[%s942_s2] sm:$0x3]  ;;  %v104_v53 = vsub.s32 1, %v99_v51 }
  0x41   :  { %v648_v46 = vpack.c.bf16 %v332_v45, %v331_v44  ;;  %v316_v48 = vld [vmem:[#allocation4 + $0x78] sm:$0xff] }
  0x42   :  { %615 = vmatpush1.bf16.msra.mxu0 %v614_v63  ;;  %v650_v49 = vpack.c.bf16 %v316_v48, %v315_v47  ;;  %v837_v55 = vrot.slane %v96_v52, %v104_v53 }
  0x43   :  { %617 = vmatprep.subr.bf16.mxu0 %v616_v3  ;;  %639 = vmatpush3.bf16.msra.mxu1 %v638_v18 }
  0x44   :  { %641 = vmatprep.subr.bf16.mxu1 %v640_v19 }
  0x46   :  { %619 = vmatpush1.bf16.msra.mxu0 %v618_v10 }
  0x47   :  { %643 = vmatpush3.bf16.msra.mxu1 %v642_v25 }
  0x48   :  { %645 = vmatprep.subr.bf16.mxu1 %v644_v26 }
  0x49   :  { %173 = vmatmul.mubr.f32.vlgmr.msra.gmra.mrb[0].mxu0 %v48_v17 }
  0x4a   :  { %178 = vmatprep.mubr.f32.mxu0 %v713_v0 }
  0x4b   :  { %647 = vmatpush3.bf16.msra.mxu1 %v646_v43 }
  0x4c   :  { %649 = vmatprep.subr.bf16.mxu1 %v648_v46 }
  0x4d   :  { %179 = vmatmul.mubr.f32.gmra.mrb[2].mxu0 %v49_v24 }
  0x4e   :  { %184 = vmatprep.mubr.f32.mxu0 %v713_v0 }
  0x4f   :  { %651 = vmatpush3.bf16.msra.mxu1 %v650_v49 }
  0x51   :  { %185 = vmatmul.mubr.f32.gmra.mrb[4].mxu0 %v50_v27 }
  0x52   :  { %190 = vmatprep.mubr.f32.mxu0 %v713_v0 }
  0x55   :  { %191 = vmatmul.mubr.f32.gmra.mrb[6].mxu0 %v51_v28 }
  0x56   :  { %196 = vmatprep.mubr.f32.mxu0 %v713_v0 }
  0x59   :  { %197 = vmatmul.mubr.f32.gmra.mrb[8].mxu0 %v52_v29 }
  0x5a   :  { %202 = vmatprep.mubr.f32.mxu0 %v713_v0 }
  0x5d   :  { %203 = vmatmul.mubr.f32.gmra.mrb[10].mxu0 %v53_v30 }
  0x5e   :  { %208 = vmatprep.mubr.f32.mxu0 %v713_v0 }
  0x61   :  { %209 = vmatmul.mubr.f32.gmra.mrb[12].mxu0 %v54_v31 }
  0x62   :  { %214 = vmatprep.mubr.f32.mxu0 %v713_v0 }
  0x65   :  { %215 = vmatmul.mubr.f32.gmra.mrb[14].mxu0 %v55_v32 }
  0x66   :  { %220 = vmatprep.mubr.f32.mxu0 %v713_v0 }
  0x69   :  { %221 = vmatmul.mubr.f32.gmra.mrb[16].mxu0 %v56_v33 }
  0x6a   :  { %226 = vmatprep.mubr.f32.mxu0 %v713_v0 }
  0x6d   :  { %227 = vmatmul.mubr.f32.gmra.mrb[18].mxu0 %v57_v34 }
  0x6e   :  { %232 = vmatprep.mubr.f32.mxu0 %v713_v0 }
  0x71   :  { %233 = vmatmul.mubr.f32.gmra.mrb[20].mxu0 %v58_v35 }
  0x72   :  { %238 = vmatprep.mubr.f32.mxu0 %v713_v0 }
  0x75   :  { %239 = vmatmul.mubr.f32.gmra.mrb[22].mxu0 %v59_v36 }
  0x76   :  { %244 = vmatprep.mubr.f32.mxu0 %v713_v0 }
  0x79   :  { %245 = vmatmul.mubr.f32.gmra.mrb[24].mxu0 %v60_v37 }
  0x7a   :  { %250 = vmatprep.mubr.f32.mxu0 %v713_v0 }
  0x7d   :  { %251 = vmatmul.mubr.f32.gmra.mrb[26].mxu0 %v61_v38 }
  0x7e   :  { %256 = vmatprep.mubr.f32.mxu0 %v713_v0 }
  0x81   :  { %257 = vmatmul.mubr.f32.gmra.mrb[28].mxu0 %v62_v39 }
  0x82   :  { %262 = vmatprep.mubr.f32.mxu0 %v713_v0  ;;  %v100_v0 = vsub.s32 0, %v99_v51 }
  0x84   :  { %v835_v54 = vrot.slane %v96_v52, %v100_v0 }
  0x85   :  { %263 = vmatmul.mubr.f32.gmra.mrb[30].mxu0 %v63_v40 }
 0x11c   :  { %v174_v56 = vpop.f32.mrb[0].mxu0 }
 0x11d   :  { %v175_v57 = vadd.f32 %v174_v56, %v835_v54  ;;  %v176_v58 = vpop.f32.mrb[1].mxu0 }
 0x11e   :  { %v177_v59 = vadd.f32 %v176_v58, %v837_v55 }
 0x11f   :  { %v269_v62 = vmax.f32 %v175_v57, 0.0 }
 0x120   :  { %v180_v60 = vpop.f32.mrb[2].mxu0  ;;  %v270_v61 = vmax.f32 %v177_v59, 0.0 }
 0x121   :  { %v181_v63 = vadd.f32 %v180_v60, %v835_v54  ;;  %v182_v1 = vpop.f32.mrb[3].mxu0 }
 0x122   :  { %v183_v2 = vadd.f32 %v182_v1, %v837_v55  ;;  %404 = vmatprep.mubr.f32.mxu1 %v270_v61 }
 0x123   :  { %405 = vmatmul.mubr.f32.vlgmr.msra.gmra.mrb[0].mxu1 %v269_v62  ;;  %v271_v5 = vmax.f32 %v181_v63, 0.0 }
 0x124   :  { %v272_v3 = vmax.f32 %v183_v2, 0.0  ;;  %v186_v4 = vpop.f32.mrb[4].mxu0 }
 0x125   :  { %v187_v6 = vadd.f32 %v186_v4, %v835_v54  ;;  %v188_v7 = vpop.f32.mrb[5].mxu0 }
 0x126   :  { %v189_v8 = vadd.f32 %v188_v7, %v837_v55  ;;  %409 = vmatprep.mubr.f32.mxu1 %v272_v3 }
 0x127   :  { %410 = vmatmul.mubr.f32.gmra.mrb[2].mxu1 %v271_v5  ;;  %v273_v11 = vmax.f32 %v187_v6, 0.0 }
 0x128   :  { %v274_v9 = vmax.f32 %v189_v8, 0.0  ;;  %v192_v10 = vpop.f32.mrb[6].mxu0 }
 0x129   :  { %v193_v12 = vadd.f32 %v192_v10, %v835_v54  ;;  %v194_v13 = vpop.f32.mrb[7].mxu0 }
 0x12a   :  { %v195_v14 = vadd.f32 %v194_v13, %v837_v55  ;;  %414 = vmatprep.mubr.f32.mxu1 %v274_v9 }
 0x12b   :  { %415 = vmatmul.mubr.f32.gmra.mrb[4].mxu1 %v273_v11  ;;  %v275_v17 = vmax.f32 %v193_v12, 0.0 }
 0x12c   :  { %v276_v15 = vmax.f32 %v195_v14, 0.0  ;;  %v198_v16 = vpop.f32.mrb[8].mxu0 }
 0x12d   :  { %v199_v18 = vadd.f32 %v198_v16, %v835_v54  ;;  %v200_v19 = vpop.f32.mrb[9].mxu0 }
 0x12e   :  { %v201_v20 = vadd.f32 %v200_v19, %v837_v55  ;;  %419 = vmatprep.mubr.f32.mxu1 %v276_v15 }
 0x12f   :  { %420 = vmatmul.mubr.f32.gmra.mrb[6].mxu1 %v275_v17  ;;  %v277_v23 = vmax.f32 %v199_v18, 0.0 }
 0x130   :  { %v278_v21 = vmax.f32 %v201_v20, 0.0  ;;  %v204_v22 = vpop.f32.mrb[10].mxu0 }
 0x131   :  { %v205_v24 = vadd.f32 %v204_v22, %v835_v54  ;;  %v206_v25 = vpop.f32.mrb[11].mxu0 }
 0x132   :  { %v207_v26 = vadd.f32 %v206_v25, %v837_v55  ;;  %424 = vmatprep.mubr.f32.mxu1 %v278_v21 }
 0x133   :  { %425 = vmatmul.mubr.f32.gmra.mrb[8].mxu1 %v277_v23  ;;  %v279_v29 = vmax.f32 %v205_v24, 0.0 }
 0x134   :  { %v280_v27 = vmax.f32 %v207_v26, 0.0  ;;  %v210_v28 = vpop.f32.mrb[12].mxu0 }
 0x135   :  { %v211_v30 = vadd.f32 %v210_v28, %v835_v54  ;;  %v212_v31 = vpop.f32.mrb[13].mxu0  ;;  %v874_v28 = vld [vmem:[%s944_s4] ss:$0 sm:$0xff] }
 0x136   :  { %v213_v32 = vadd.f32 %v212_v31, %v837_v55  ;;  %429 = vmatprep.mubr.f32.mxu1 %v280_v27 }
 0x137   :  { %430 = vmatmul.mubr.f32.gmra.mrb[10].mxu1 %v279_v29  ;;  %v281_v35 = vmax.f32 %v211_v30, 0.0 }
 0x138   :  { %v282_v33 = vmax.f32 %v213_v32, 0.0  ;;  %v216_v34 = vpop.f32.mrb[14].mxu0 }
 0x139   :  { %v217_v36 = vadd.f32 %v216_v34, %v835_v54  ;;  %v218_v37 = vpop.f32.mrb[15].mxu0 }
 0x13a   :  { %v219_v38 = vadd.f32 %v218_v37, %v837_v55  ;;  %434 = vmatprep.mubr.f32.mxu1 %v282_v33 }
 0x13b   :  { %435 = vmatmul.mubr.f32.gmra.mrb[12].mxu1 %v281_v35  ;;  %v283_v41 = vmax.f32 %v217_v36, 0.0 }
 0x13c   :  { %v284_v39 = vmax.f32 %v219_v38, 0.0  ;;  %v222_v40 = vpop.f32.mrb[16].mxu0 }
 0x13d   :  { %v223_v42 = vadd.f32 %v222_v40, %v835_v54  ;;  %v224_v43 = vpop.f32.mrb[17].mxu0 }
 0x13e   :  { %v225_v44 = vadd.f32 %v224_v43, %v837_v55  ;;  %439 = vmatprep.mubr.f32.mxu1 %v284_v39 }
 0x13f   :  { %440 = vmatmul.mubr.f32.gmra.mrb[14].mxu1 %v283_v41  ;;  %v285_v47 = vmax.f32 %v223_v42, 0.0 }
 0x140   :  { %v286_v45 = vmax.f32 %v225_v44, 0.0  ;;  %v228_v46 = vpop.f32.mrb[18].mxu0 }
 0x141   :  { %v229_v48 = vadd.f32 %v228_v46, %v835_v54  ;;  %v230_v49 = vpop.f32.mrb[19].mxu0 }
 0x142   :  { %v231_v50 = vadd.f32 %v230_v49, %v837_v55  ;;  %444 = vmatprep.mubr.f32.mxu1 %v286_v45 }
 0x143   :  { %445 = vmatmul.mubr.f32.gmra.mrb[16].mxu1 %v285_v47  ;;  %v287_v52 = vmax.f32 %v229_v48, 0.0 }
 0x144   :  { %v288_v51 = vmax.f32 %v231_v50, 0.0  ;;  %v234_v0 = vpop.f32.mrb[20].mxu0 }
 0x145   :  { %v235_v53 = vadd.f32 %v234_v0, %v835_v54  ;;  %v236_v56 = vpop.f32.mrb[21].mxu0 }
 0x146   :  { %v237_v57 = vadd.f32 %v236_v56, %v837_v55  ;;  %449 = vmatprep.mubr.f32.mxu1 %v288_v51 }
 0x147   :  { %450 = vmatmul.mubr.f32.gmra.mrb[18].mxu1 %v287_v52  ;;  %v289_v60 = vmax.f32 %v235_v53, 0.0 }
 0x148   :  { %v290_v58 = vmax.f32 %v237_v57, 0.0  ;;  %v240_v59 = vpop.f32.mrb[22].mxu0 }
 0x149   :  { %v241_v61 = vadd.f32 %v240_v59, %v835_v54  ;;  %v242_v62 = vpop.f32.mrb[23].mxu0 }
 0x14a   :  { %v243_v63 = vadd.f32 %v242_v62, %v837_v55  ;;  %454 = vmatprep.mubr.f32.mxu1 %v290_v58 }
 0x14b   :  { %455 = vmatmul.mubr.f32.gmra.mrb[20].mxu1 %v289_v60  ;;  %v291_v3 = vmax.f32 %v241_v61, 0.0 }
 0x14c   :  { %v292_v1 = vmax.f32 %v243_v63, 0.0  ;;  %v246_v2 = vpop.f32.mrb[24].mxu0 }
 0x14d   :  { %v247_v4 = vadd.f32 %v246_v2, %v835_v54  ;;  %v248_v5 = vpop.f32.mrb[25].mxu0 }
 0x14e   :  { %v249_v6 = vadd.f32 %v248_v5, %v837_v55  ;;  %459 = vmatprep.mubr.f32.mxu1 %v292_v1 }
 0x14f   :  { %460 = vmatmul.mubr.f32.gmra.mrb[22].mxu1 %v291_v3  ;;  %v293_v9 = vmax.f32 %v247_v4, 0.0 }
 0x150   :  { %v294_v7 = vmax.f32 %v249_v6, 0.0  ;;  %v252_v8 = vpop.f32.mrb[26].mxu0 }
 0x151   :  { %v253_v10 = vadd.f32 %v252_v8, %v835_v54  ;;  %v254_v11 = vpop.f32.mrb[27].mxu0 }
 0x152   :  { %v255_v12 = vadd.f32 %v254_v11, %v837_v55  ;;  %464 = vmatprep.mubr.f32.mxu1 %v294_v7 }
 0x153   :  { %465 = vmatmul.mubr.f32.gmra.mrb[24].mxu1 %v293_v9  ;;  %v295_v15 = vmax.f32 %v253_v10, 0.0 }
 0x154   :  { %v296_v13 = vmax.f32 %v255_v12, 0.0  ;;  %v258_v14 = vpop.f32.mrb[28].mxu0 }
 0x155   :  { %v259_v16 = vadd.f32 %v258_v14, %v835_v54  ;;  %v260_v17 = vpop.f32.mrb[29].mxu0 }
 0x156   :  { %v261_v18 = vadd.f32 %v260_v17, %v837_v55  ;;  %469 = vmatprep.mubr.f32.mxu1 %v296_v13 }
 0x157   :  { %470 = vmatmul.mubr.f32.gmra.mrb[26].mxu1 %v295_v15  ;;  %v297_v21 = vmax.f32 %v259_v16, 0.0 }
 0x158   :  { %v298_v19 = vmax.f32 %v261_v18, 0.0  ;;  %v264_v20 = vpop.f32.mrb[30].mxu0 }
 0x159   :  { %v265_v22 = vadd.f32 %v264_v20, %v835_v54  ;;  %v266_v23 = vpop.f32.mrb[31].mxu0 }
 0x15a   :  { %v267_v24 = vadd.f32 %v266_v23, %v837_v55  ;;  %474 = vmatprep.mubr.f32.mxu1 %v298_v19 }
 0x15b   :  { %475 = vmatmul.mubr.f32.gmra.mrb[28].mxu1 %v297_v21  ;;  %v299_v26 = vmax.f32 %v265_v22, 0.0 }
 0x15c   :  { %v300_v25 = vmax.f32 %v267_v24, 0.0 }
 0x15e   :  { %479 = vmatprep.mubr.f32.mxu1 %v300_v25 }
 0x15f   :  { %480 = vmatmul.mubr.f32.gmra.mrb[30].mxu1 %v299_v26 }
 0x1f6   :  { %v540_v27 = vpop.f32.mrb[0].mxu1 }
 0x1f7   :  { %v541_v29 = vpop.f32.mrb[1].mxu1 }
 0x1f8   :  { %v542_v30 = vadd.f32 %v541_v29, %v540_v27 }
 0x1fa   :  { %v407_v31 = vadd.f32 %v542_v30, %v874_v28  ;;  %v543_v54 = vpop.f32.mrb[2].mxu1 }
 0x1fb   :  { %v544_v32 = vpop.f32.mrb[3].mxu1 }
 0x1fc   :  { %485 = vst [vmem:[%s945_s5] sm:$0xff] %v407_v31  ;;  %v545_v55 = vadd.f32 %v544_v32, %v543_v54 }
 0x1fe   :  { %v412_v33 = vadd.f32 %v545_v55, %v874_v28  ;;  %v546_v34 = vpop.f32.mrb[4].mxu1 }
 0x1ff   :  { %v547_v35 = vpop.f32.mrb[5].mxu1 }
 0x200   :  { %486 = vst [vmem:[%s945_s5 + $0x8] sm:$0xff] %v412_v33  ;;  %v548_v36 = vadd.f32 %v547_v35, %v546_v34 }
 0x202   :  { %v417_v37 = vadd.f32 %v548_v36, %v874_v28  ;;  %v549_v38 = vpop.f32.mrb[6].mxu1 }
 0x203   :  { %v550_v39 = vpop.f32.mrb[7].mxu1 }
 0x204   :  { %487 = vst [vmem:[%s945_s5 + $0x10] sm:$0xff] %v417_v37  ;;  %v551_v40 = vadd.f32 %v550_v39, %v549_v38 }
 0x206   :  { %v422_v41 = vadd.f32 %v551_v40, %v874_v28  ;;  %v552_v42 = vpop.f32.mrb[8].mxu1 }
 0x207   :  { %v553_v43 = vpop.f32.mrb[9].mxu1 }
 0x208   :  { %488 = vst [vmem:[%s945_s5 + $0x18] sm:$0xff] %v422_v41  ;;  %v554_v44 = vadd.f32 %v553_v43, %v552_v42 }
 0x20a   :  { %v427_v45 = vadd.f32 %v554_v44, %v874_v28  ;;  %v555_v46 = vpop.f32.mrb[10].mxu1 }
 0x20b   :  { %v556_v47 = vpop.f32.mrb[11].mxu1 }
 0x20c   :  { %489 = vst [vmem:[%s945_s5 + $0x20] sm:$0xff] %v427_v45  ;;  %v557_v48 = vadd.f32 %v556_v47, %v555_v46 }
 0x20e   :  { %v432_v49 = vadd.f32 %v557_v48, %v874_v28  ;;  %v558_v50 = vpop.f32.mrb[12].mxu1 }
 0x20f   :  { %v559_v51 = vpop.f32.mrb[13].mxu1 }
 0x210   :  { %490 = vst [vmem:[%s945_s5 + $0x28] sm:$0xff] %v432_v49  ;;  %v560_v0 = vadd.f32 %v559_v51, %v558_v50 }
 0x212   :  { %v437_v52 = vadd.f32 %v560_v0, %v874_v28  ;;  %v561_v53 = vpop.f32.mrb[14].mxu1 }
 0x213   :  { %v562_v56 = vpop.f32.mrb[15].mxu1 }
 0x214   :  { %491 = vst [vmem:[%s945_s5 + $0x30] sm:$0xff] %v437_v52  ;;  %v563_v57 = vadd.f32 %v562_v56, %v561_v53 }
 0x216   :  { %v442_v58 = vadd.f32 %v563_v57, %v874_v28  ;;  %v564_v59 = vpop.f32.mrb[16].mxu1 }
 0x217   :  { %v565_v60 = vpop.f32.mrb[17].mxu1 }
 0x218   :  { %492 = vst [vmem:[%s945_s5 + $0x38] sm:$0xff] %v442_v58  ;;  %v566_v61 = vadd.f32 %v565_v60, %v564_v59 }
 0x21a   :  { %v447_v62 = vadd.f32 %v566_v61, %v874_v28  ;;  %v567_v63 = vpop.f32.mrb[18].mxu1 }
 0x21b   :  { %v568_v1 = vpop.f32.mrb[19].mxu1 }
 0x21c   :  { %493 = vst [vmem:[%s945_s5 + $0x40] sm:$0xff] %v447_v62  ;;  %v569_v2 = vadd.f32 %v568_v1, %v567_v63 }
 0x21e   :  { %v452_v3 = vadd.f32 %v569_v2, %v874_v28  ;;  %v570_v4 = vpop.f32.mrb[20].mxu1 }
 0x21f   :  { %v571_v5 = vpop.f32.mrb[21].mxu1 }
 0x220   :  { %494 = vst [vmem:[%s945_s5 + $0x48] sm:$0xff] %v452_v3  ;;  %v572_v6 = vadd.f32 %v571_v5, %v570_v4 }
 0x222   :  { %v457_v7 = vadd.f32 %v572_v6, %v874_v28  ;;  %v573_v8 = vpop.f32.mrb[22].mxu1 }
 0x223   :  { %v574_v9 = vpop.f32.mrb[23].mxu1 }
 0x224   :  { %495 = vst [vmem:[%s945_s5 + $0x50] sm:$0xff] %v457_v7  ;;  %v575_v10 = vadd.f32 %v574_v9, %v573_v8 }
 0x226   :  { %v462_v11 = vadd.f32 %v575_v10, %v874_v28  ;;  %v576_v12 = vpop.f32.mrb[24].mxu1 }
 0x227   :  { %v577_v13 = vpop.f32.mrb[25].mxu1 }
 0x228   :  { %496 = vst [vmem:[%s945_s5 + $0x58] sm:$0xff] %v462_v11  ;;  %v578_v14 = vadd.f32 %v577_v13, %v576_v12 }
 0x22a   :  { %v467_v15 = vadd.f32 %v578_v14, %v874_v28  ;;  %v579_v16 = vpop.f32.mrb[26].mxu1 }
 0x22b   :  { %v580_v17 = vpop.f32.mrb[27].mxu1 }
 0x22c   :  { %497 = vst [vmem:[%s945_s5 + $0x60] sm:$0xff] %v467_v15  ;;  %v581_v18 = vadd.f32 %v580_v17, %v579_v16 }
 0x22e   :  { %v472_v19 = vadd.f32 %v581_v18, %v874_v28  ;;  %v582_v20 = vpop.f32.mrb[28].mxu1 }
 0x22f   :  { %v583_v21 = vpop.f32.mrb[29].mxu1 }
 0x230   :  { %498 = vst [vmem:[%s945_s5 + $0x68] sm:$0xff] %v472_v19  ;;  %v584_v22 = vadd.f32 %v583_v21, %v582_v20 }
 0x232   :  { %v477_v23 = vadd.f32 %v584_v22, %v874_v28  ;;  %v585_v24 = vpop.f32.mrb[30].mxu1 }
 0x233   :  { %v586_v25 = vpop.f32.mrb[31].mxu1 }
 0x234   :  { %499 = vst [vmem:[%s945_s5 + $0x70] sm:$0xff] %v477_v23  ;;  %v587_v26 = vadd.f32 %v586_v25, %v585_v24 }
 0x236   :  { %v482_v27 = vadd.f32 %v587_v26, %v874_v28 }
 0x238   :  { %500 = vst [vmem:[%s945_s5 + $0x78] sm:$0xff] %v482_v27 }
 0x239   :  { %505 = vsyncpa [#allocation3], 1 }
 0x23a   :  { %506 = vsyncpa [#allocation5], 1 }

</bundles_post_ra>
